<compile_context>
chip_gen: v7x
topology: tpu7x:2x2x1
jax: 0.10.0
libtpu: 0.0.40
codegen_flags: <defaults>
</compile_context>

<pallas_src>
import jax
import jax.numpy as jnp
from jax.experimental import pallas as pl
from jax.experimental.pallas import tpu as pltpu


def make_dqn_loss_kernel(gamma: float, batch: int):
    inv_batch = 1.0 / float(batch)
    gamma = float(gamma)

    def kernel(st_ref, sts_ref, w1_ref, b1_ref, w2_ref, b2_ref,
               a_ref, r_ref, d_ref, out_ref):
        # Online net:  Q1 = st @ W1^T + b1    (W1 stored (A, H): H on lanes)
        q1 = jax.lax.dot_general(
            st_ref[...], w1_ref[...],
            dimension_numbers=(((1,), (1,)), ((), ())),
            preferred_element_type=jnp.float32) + b1_ref[...]      # (B, A)
        # Target net: Q2 = sts @ W2^T + b2
        q2 = jax.lax.dot_general(
            sts_ref[...], w2_ref[...],
            dimension_numbers=(((1,), (1,)), ((), ())),
            preferred_element_type=jnp.float32) + b2_ref[...]      # (B, A)

        B, A = q1.shape
        act = a_ref[...]                                           # (B, 1) int32
        col = jax.lax.broadcasted_iota(jnp.int32, (B, A), 1)

        # pred_Q = gather(Q1, 1, a)
        pred_q = jnp.sum(jnp.where(col == act, q1, 0.0),
                         axis=1, keepdims=True)                    # (B, 1)
        # max_Q = max over target-net actions (stop-grad: forward-only kernel)
        max_q = jnp.max(q2, axis=1, keepdims=True)                 # (B, 1)

        # bootstrapped return:  r + gamma * max_Q * D
        target = r_ref[...] + gamma * max_q * d_ref[...]           # (B, 1)

        # MSELoss (mean over batch) -> single scalar into SMEM
        diff = pred_q - target
        out_ref[0] = jnp.sum(diff * diff) * inv_batch

    return kernel


def dqn_loss(st, sts, w1, b1, w2, b2, a, r, d, gamma):
    """st,sts:(B,H)  w1,w2:(A,H)  b1,b2:(1,A)  a:(B,1) int32  r,d:(B,1) f32.

    Whole problem fits in VMEM; single grid point, zero wrapper-side HLOs.
    """
    B = st.shape[0]
    vmem = pl.BlockSpec(memory_space=pltpu.MemorySpace.VMEM)
    smem = pl.BlockSpec(memory_space=pltpu.MemorySpace.SMEM)

    out = pl.pallas_call(
        make_dqn_loss_kernel(gamma, B),
        out_shape=jax.ShapeDtypeStruct((1,), jnp.float32),
        in_specs=[vmem] * 9,
        out_specs=smem,
    )(st, sts, w1, b1, w2, b2, a, r, d)
    return out[0]


if __name__ == "__main__":
    # Small, deterministic problem:
    B, H, A = 8, 32, 4          # batch, state-feature dim, num actions
    gamma = 0.99

    key = jax.random.PRNGKey(0)
    ks = jax.random.split(key, 8)

    # deterministic "agent" / "prev_agent_state" params, stored in the
    # kernel-native layout: W is (A, H), b is (1, A).
    w1 = jax.random.normal(ks[0], (A, H), jnp.float32) * 0.1
    b1 = jax.random.normal(ks[1], (1, A), jnp.float32) * 0.1
    w2 = jax.random.normal(ks[2], (A, H), jnp.float32) * 0.1
    b2 = jax.random.normal(ks[3], (1, A), jnp.float32) * 0.1

    st  = jax.random.normal(ks[4], (B, H), jnp.float32)            # states
    sts = jax.random.normal(ks[5], (B, H), jnp.float32)            # next states
    a   = jax.random.randint(ks[6], (B, 1), 0, A, dtype=jnp.int32) # actions
    r   = jax.random.normal(ks[7], (B, 1), jnp.float32)            # rewards
    d   = jnp.ones((B, 1), jnp.float32)                            # (1 - done)

    loss = dqn_loss(st, sts, w1, b1, w2, b2, a, r, d, gamma)
    jax.block_until_ready(loss)

    # pure-JAX reference check
    q_on = st @ w1.T + b1                                          # (B, A)
    q_tg = sts @ w2.T + b2                                         # (B, A)
    pred_q = q_on[jnp.arange(B), a[:, 0]]
    target = r[:, 0] + gamma * jnp.max(q_tg, axis=1) * d[:, 0]
    ref = jnp.mean((pred_q - target) ** 2)
    assert jnp.allclose(loss, ref, rtol=1e-5, atol=1e-5), (loss, ref)

    print("KERNEL_OK")
</pallas_src>

<mosaic_0001>
module attributes {stable_mosaic.version = 11 : i64} {
  func.func @kernel(%arg0: memref<8x32xf32, #tpu.memory_space<vmem>>, %arg1: memref<8x32xf32, #tpu.memory_space<vmem>>, %arg2: memref<4x32xf32, #tpu.memory_space<vmem>>, %arg3: memref<1x4xf32, #tpu.memory_space<vmem>>, %arg4: memref<4x32xf32, #tpu.memory_space<vmem>>, %arg5: memref<1x4xf32, #tpu.memory_space<vmem>>, %arg6: memref<8x1xi32, #tpu.memory_space<vmem>>, %arg7: memref<8x1xf32, #tpu.memory_space<vmem>>, %arg8: memref<8x1xf32, #tpu.memory_space<vmem>>, %arg9: memref<1xf32, #tpu.memory_space<smem>>) attributes {dimension_semantics = [], scalar_prefetch = 0 : i64, scratch_operands = 0 : i64, tpu.core_type = #tpu.core_type<tc>} {
    %c0 = arith.constant 0 : index
    %c0_0 = arith.constant 0 : index
    %0 = vector.load %arg0[%c0, %c0_0] : memref<8x32xf32, #tpu.memory_space<vmem>>, vector<8x32xf32>
    %c0_1 = arith.constant 0 : index
    %c0_2 = arith.constant 0 : index
    %1 = vector.load %arg2[%c0_1, %c0_2] : memref<4x32xf32, #tpu.memory_space<vmem>>, vector<4x32xf32>
    %cst = arith.constant dense<0.000000e+00> : vector<8x4xf32>
    %2 = tpu.matmul %0, %1, %cst {dimension_numbers = #tpu.dot_dimension_numbers<[1], [1], [0], [0], [0, 0, 1, 0], [], []>} : vector<8x32xf32>, vector<4x32xf32>, vector<8x4xf32> -> vector<8x4xf32>
    %c0_3 = arith.constant 0 : index
    %c0_4 = arith.constant 0 : index
    %3 = vector.load %arg3[%c0_3, %c0_4] : memref<1x4xf32, #tpu.memory_space<vmem>>, vector<1x4xf32>
    %4 = vector.broadcast %3 : vector<1x4xf32> to vector<8x4xf32>
    %5 = arith.addf %2, %4 : vector<8x4xf32>
    %c0_5 = arith.constant 0 : index
    %c0_6 = arith.constant 0 : index
    %6 = vector.load %arg1[%c0_5, %c0_6] : memref<8x32xf32, #tpu.memory_space<vmem>>, vector<8x32xf32>
    %c0_7 = arith.constant 0 : index
    %c0_8 = arith.constant 0 : index
    %7 = vector.load %arg4[%c0_7, %c0_8] : memref<4x32xf32, #tpu.memory_space<vmem>>, vector<4x32xf32>
    %cst_9 = arith.constant dense<0.000000e+00> : vector<8x4xf32>
    %8 = tpu.matmul %6, %7, %cst_9 {dimension_numbers = #tpu.dot_dimension_numbers<[1], [1], [0], [0], [0, 0, 1, 0], [], []>} : vector<8x32xf32>, vector<4x32xf32>, vector<8x4xf32> -> vector<8x4xf32>
    %c0_10 = arith.constant 0 : index
    %c0_11 = arith.constant 0 : index
    %9 = vector.load %arg5[%c0_10, %c0_11] : memref<1x4xf32, #tpu.memory_space<vmem>>, vector<1x4xf32>
    %10 = vector.broadcast %9 : vector<1x4xf32> to vector<8x4xf32>
    %11 = arith.addf %8, %10 : vector<8x4xf32>
    %c0_12 = arith.constant 0 : index
    %c0_13 = arith.constant 0 : index
    %12 = vector.load %arg6[%c0_12, %c0_13] : memref<8x1xi32, #tpu.memory_space<vmem>>, vector<8x1xi32>
    %13 = tpu.iota {dimensions = array<i32: 1>} : vector<8x4xi32>
    %14 = vector.broadcast %12 : vector<8x1xi32> to vector<8x4xi32>
    %15 = arith.cmpi eq, %13, %14 : vector<8x4xi32>
    %cst_14 = arith.constant 0.000000e+00 : f32
    %16 = vector.broadcast %cst_14 : f32 to vector<8x4xf32>
    %17 = arith.select %15, %5, %16 : vector<8x4xi1>, vector<8x4xf32>
    %cst_15 = arith.constant dense<0.000000e+00> : vector<8xf32>
    %18 = vector.multi_reduction <add>, %17, %cst_15 [1] : vector<8x4xf32> to vector<8xf32>
    %19 = vector.shape_cast %18 : vector<8xf32> to vector<8x1xf32>
    %cst_16 = arith.constant dense<0xFF800000> : vector<8xf32>
    %20 = vector.multi_reduction <maximumf>, %11, %cst_16 [1] : vector<8x4xf32> to vector<8xf32>
    %21 = vector.shape_cast %20 : vector<8xf32> to vector<8x1xf32>
    %c0_17 = arith.constant 0 : index
    %c0_18 = arith.constant 0 : index
    %22 = vector.load %arg7[%c0_17, %c0_18] : memref<8x1xf32, #tpu.memory_space<vmem>>, vector<8x1xf32>
    %cst_19 = arith.constant 9.900000e-01 : f32
    %23 = vector.broadcast %cst_19 : f32 to vector<8x1xf32>
    %24 = arith.mulf %23, %21 : vector<8x1xf32>
    %c0_20 = arith.constant 0 : index
    %c0_21 = arith.constant 0 : index
    %25 = vector.load %arg8[%c0_20, %c0_21] : memref<8x1xf32, #tpu.memory_space<vmem>>, vector<8x1xf32>
    %26 = arith.mulf %24, %25 : vector<8x1xf32>
    %27 = arith.addf %22, %26 : vector<8x1xf32>
    %28 = arith.subf %19, %27 : vector<8x1xf32>
    %29 = arith.mulf %28, %28 : vector<8x1xf32>
    %30 = vector.shape_cast %29 : vector<8x1xf32> to vector<1x8x1xf32>
    %cst_22 = arith.constant dense<0.000000e+00> : vector<1xf32>
    %31 = vector.multi_reduction <add>, %30, %cst_22 [1, 2] : vector<1x8x1xf32> to vector<1xf32>
    %32 = vector.shape_cast %31 : vector<1xf32> to vector<1x1x1xf32>
    %33 = vector.extract %32[0, 0, 0] : f32 from vector<1x1x1xf32>
    %cst_23 = arith.constant 1.250000e-01 : f32
    %34 = arith.mulf %33, %cst_23 : f32
    %c0_24 = arith.constant 0 : index
    %35 = memref.load %arg9[%c0_24] : memref<1xf32, #tpu.memory_space<smem>>
    memref.store %34, %arg9[%c0_24] : memref<1xf32, #tpu.memory_space<smem>>
    return
  }
}

</mosaic_0001>

<bundles_post_ra>
// kernel: tpu_custom_call.1
= control target key start
LH: loop header
LB: loop body
LE: loop exit
PB: predicated region body
PF: predicated region fallthrough
CT: control target
= control target key end

     0   :  { %vm42_vm0 = vcmask 261120   ;;  %v292_v1 = vmov 0.0   ;;  %vm293_vm1 = vmmov 0   ;;  %s389_s0 = inlined_call_operand.vmem [shape: f32[8,32], index: 0, kind: input, shape index: {}]   ;;  %s390_s1 = inlined_call_operand.vmem [shape: f32[8,32], index: 1, kind: input, shape index: {}]   ;;  %s391_s2 = inlined_call_operand.vmem [shape: f32[4,32], index: 2, kind: input, shape index: {}]   ;;  %s392_s3 = inlined_call_operand.vmem [shape: f32[1,4], index: 3, kind: input, shape index: {}]   ;;  %s393_s4 = inlined_call_operand.vmem [shape: f32[4,32], index: 4, kind: input, shape index: {}]   ;;  %s394_s5 = inlined_call_operand.vmem [shape: f32[1,4], index: 5, kind: input, shape index: {}]   ;;  %s395_s6 = inlined_call_operand.vmem [shape: s32[8,1], index: 6, kind: input, shape index: {}]   ;;  %s396_s7 = inlined_call_operand.vmem [shape: f32[8,1], index: 7, kind: input, shape index: {}]   ;;  %s397_s8 = inlined_call_operand.vmem [shape: f32[8,1], index: 8, kind: input, shape index: {}]   ;;  %s398_s9 = inlined_call_operand.hbm [shape: f32[1], index: 9, kind: output, shape index: {}]  }
   0x1   :  { %v120_v0 = vld [vmem:[%s393_s4] sm:$0xf]  ;;  %268 = vmatprep.subr.mxu1 %v292_v1  ;;  %270 = vmatprep.mubr.msk.f32.mxu1 %vm293_vm1, %v292_v1 }
   0x2   :  { %v34_v2 = vld [vmem:[%s391_s2] sm:$0xf]  ;;  %269 = vmatpush3.xpose.msk.msra.mxu1 %vm42_vm0, %v120_v0  ;;  %263 = vmatprep.subr.mxu0 %v292_v1 }
   0x3   :  { %v119_v3 = vld [vmem:[%s390_s1] sm:$0xff] }
   0x4   :  { %v204_v4 = vld [vmem:[%s395_s6] sm:$0xff] }
   0x5   :  { %14 = vsyncpa [#allocation3], 0  ;;  %264 = vmatpush3.xpose.msk.msra.mxu0 %vm42_vm0, %v34_v2  ;;  %265 = vmatprep.mubr.msk.f32.mxu0 %vm293_vm1, %v292_v1  ;;  %v33_v5 = vld [vmem:[%s389_s0] sm:$0xff]  ;;  %v294_v6 = vmov 0   ;;  %v205_v7 = vlaneseq  ;;  %vm212_vm2 = vcmask 31744   ;;  %vm226_vm4 = vcmask 7168  }
   0x6   :  { %279 = vset.pattern.permute.xlu0 %v294_v6  ;;  %271 = vmatmul.mubr.msk.f32.vlgmr.msra.gmra.mrb[0].mxu1 %vm42_vm0, %v119_v3  ;;  %v256_v9 = vld [vmem:[%s394_s5] ss:$0 sm:$0xff]  ;;  %s280_s22 = scalar_lea.hbm %s398_s9, 16 }
   0x7   :  { %208 = vperm.xlu0 %279, %v204_v4   ;;  %v206_v8 = vand.u32 127, %v205_v7  ;;  %v253_v11 = vld [vmem:[%s392_s3] ss:$0 sm:$0xff]  ;;  %p281_p0 = scmp.ne.s32.totalorder %s398_s9, %s280_s22  ;;  %p284_p1 = scmp.lt.u32.totalorder %s280_s22, %s398_s9 }
   0x8   :  { %266 = vmatmul.mubr.msk.f32.vlgmr.msra.gmra.mrb[0].mxu0 %vm42_vm0, %v33_v5  ;;  %v221_v21 = vld [vmem:[%s397_s8] sm:$0xff] }
   0x9   :  { %v219_v24 = vld [vmem:[%s396_s7] sm:$0xff]  ;;  %p286_p2 = pnand %p284_p1, %p281_p0 }
  0x86   :  { %v209_v10 = vpop.permute.xlu0 %208 }
  0x87   :  { %vm210_vm3 = vcmp.eq.s32.totalorder %v206_v8, %v209_v10 }
  0xd9   :  { %v200_v12 = vpop.f32.mrb[0].mxu1 }
  0xda   :  { %v201_v13 = vadd.f32 %v256_v9, %v200_v12  ;;  %v272_v14 = vpop.f32.mrb[1].mxu1 }
  0xdb   :  { %v115_v15 = vpop.f32.mrb[0].mxu0 }
  0xdc   :  { %v116_v16 = vadd.f32 %v253_v11, %v115_v15  ;;  %v267_v17 = vpop.f32.mrb[1].mxu0  ;;  %v216_v18 = vsel %vm212_vm2, %v201_v13, -inf }
  0xdd   :  { %217 = vmax.xlane.f32.xlu0 %v216_v18 }
  0xde   :  { %v211_v19 = vsel %vm210_vm3, %v116_v16, 0.0 }
  0xdf   :  { %v213_v20 = vsel %vm212_vm2, %v211_v19, 0.0 }
  0xe0   :  { %214 = vadd.xlane.f32.xlu1 %v213_v20 }
 0x16a   :  { %v218_v22 = vpop.xlane.xlu0 %217 }
 0x16b   :  { %v220_v23 = vmul.f32 0.99, %v218_v22 }
 0x16d   :  { %v222_v25 = vmul.f32 %v221_v21, %v220_v23  ;;  %v215_v26 = vpop.xlane.xlu1 %214 }
 0x16f   :  { %v223_v27 = vadd.f32 %v222_v25, %v219_v24 }
 0x171   :  { %v224_v28 = vsub.f32 %v215_v26, %v223_v27 }
 0x173   :  { %v225_v29 = vmul.f32 %v224_v28, %v224_v28 }
 0x175   :  { %v227_v30 = vsel %vm226_vm4, %v225_v29, 0.0 }
 0x176   :  { %228 = vadd.xlane.f32.xlu1 %v227_v30 }
 0x203   :  { %v229_v31 = vpop.xlane.xlu1 %228 }
 0x204   :  { %v230_v32 = vrot.slane %v229_v31, 4 }
 0x206   :  { %v231_v33 = vadd.f32 %v230_v32, %v229_v31 }
 0x208   :  { %v232_v34 = vrot.slane %v231_v33, 2 }
 0x20a   :  { %v233_v35 = vadd.f32 %v232_v34, %v231_v33 }
 0x20c   :  { %v234_v36 = vrot.slane %v233_v35, 1 }
 0x20e   :  { %v235_v37 = vadd.f32 %v234_v36, %v233_v35 }
 0x210   :  { %273 = vpush %v235_v37 }
 0x241   :  { %s274_s8 = spop %273 }
 0x242   :  { %s237_s20 = smul.f32 0.125, %s274_s8 }
 0x244   :  { %239 = sst [smem:[#allocation2]] %s237_s20 }
 0x245   :  { %289 = shalt.err (!%p286_p2)
}
 0x246   :  { %s295_s27 = smov [#allocation2]  }
 0x247   :  { %247 = dma.smem_to_hbm %s295_s27, 16, %s398_s9, [#allocation3]  }
 0x248   :  { %290 = dma.done.wait [#allocation3], 16  }
 0x249   :  { %291 = vsyncadd [#allocation3], 4294967280 }
 0x24a   :  { %251 = sfence }
 0x24b   :  { %252 = vsyncpa [#allocation3], 1 }

</bundles_post_ra>
